<compile_context>
chip_gen: v7x
topology: tpu7x:2x2x1
jax: 0.10.0
libtpu: 0.0.40
codegen_flags: <defaults>
</compile_context>

<pallas_src>
import jax
import jax.numpy as jnp
from jax.experimental import pallas as pl
from jax.experimental.pallas import tpu as pltpu


def _round_up(x, m):
    return ((x + m - 1) // m) * m


def usa_kernel(obs_ref, act_ref, w1o_ref, w1a_ref, b1_ref,
               w2_ref, b2_ref, w3_ref, b3_ref, o_ref):
    # fc1 with fused concat: two bf16 MXU matmuls, f32 accumulation.
    h1 = (jnp.dot(obs_ref[...], w1o_ref[...], preferred_element_type=jnp.float32)
          + jnp.dot(act_ref[...], w1a_ref[...], preferred_element_type=jnp.float32)
          + b1_ref[...])
    h1 = jnp.maximum(h1, 0.0)                                   # ReLU (VPU, f32)

    # fc2 (bf16 MXU, f32 accumulate).
    h2 = jnp.dot(h1.astype(jnp.bfloat16), w2_ref[...],
                 preferred_element_type=jnp.float32) + b2_ref[...]
    h2 = jnp.maximum(h2, 0.0)                                   # ReLU

    # fc3 (H -> 1): VPU multiply + lane reduction; w3 is a [1, H] row,
    # b3 is a scalar read from SMEM and broadcast.
    z = jnp.sum(h2 * w3_ref[...], axis=-1, keepdims=True) + b3_ref[0, 0]

    # Numerically stable softplus: max(z, 0) + log1p(exp(-|z|))  (EUP ops).
    o_ref[...] = jnp.maximum(z, 0.0) + jnp.log1p(jnp.exp(-jnp.abs(z)))


def usa_forward(obs, action, params, *, block_b=1024):
    """obs: [B, nS], action: [B, nA] -> [B, 1] float32."""
    w1, b1, w2, b2, w3, b3 = params
    B, nS = obs.shape
    nA = action.shape[-1]
    H = w2.shape[0]

    # preprocess_obs for a Box observation space is a float passthrough.
    # Stream the big per-row tensors in bf16 to halve HBM read traffic.
    obs_b = obs.astype(jnp.bfloat16)
    act_b = action.astype(jnp.bfloat16)

    # Fuse the concat: split fc1 weight into obs / action halves.
    w1o = w1[:nS, :].astype(jnp.bfloat16)
    w1a = w1[nS:, :].astype(jnp.bfloat16)
    w2b = w2.astype(jnp.bfloat16)
    b1f = b1.reshape(1, H).astype(jnp.float32)
    b2f = b2.reshape(1, H).astype(jnp.float32)
    w3r = w3.reshape(1, H).astype(jnp.float32)        # row for VPU mul + reduce
    b3f = b3.reshape(1, 1).astype(jnp.float32)        # scalar, lives in SMEM

    # Batch tiling: TB a multiple of 16 (bf16 sublane packing); pad B if needed.
    TB = min(block_b, _round_up(B, 16))
    B_pad = _round_up(B, TB)
    if B_pad != B:
        obs_b = jnp.pad(obs_b, ((0, B_pad - B), (0, 0)))
        act_b = jnp.pad(act_b, ((0, B_pad - B), (0, 0)))

    grid = (B_pad // TB,)
    resident = lambda shape: pl.BlockSpec(shape, lambda i: (0, 0))

    out = pl.pallas_call(
        usa_kernel,
        out_shape=jax.ShapeDtypeStruct((B_pad, 1), jnp.float32),
        grid=grid,
        in_specs=[
            pl.BlockSpec((TB, nS), lambda i: (i, 0)),           # obs tile (streamed)
            pl.BlockSpec((TB, nA), lambda i: (i, 0)),           # action tile (streamed)
            resident((nS, H)),                                   # w1_obs (VMEM-resident)
            resident((nA, H)),                                   # w1_act
            resident((1, H)),                                    # b1
            resident((H, H)),                                    # w2
            resident((1, H)),                                    # b2
            resident((1, H)),                                    # w3 row
            pl.BlockSpec(memory_space=pltpu.MemorySpace.SMEM),   # b3 scalar
        ],
        out_specs=pl.BlockSpec((TB, 1), lambda i: (i, 0)),
        compiler_params=pltpu.CompilerParams(
            dimension_semantics=("parallel",)),
    )(obs_b, act_b, w1o, w1a, b1f, w2b, b2f, w3r, b3f)
    return out[:B]


def init_params(key, n_in, hidden):
    # Deterministic synthetic init (PyTorch-like uniform fan-in scaling), f32.
    ks = jax.random.split(key, 6)

    def u(k, shape, fan_in):
        bound = 1.0 / jnp.sqrt(fan_in)
        return jax.random.uniform(k, shape, jnp.float32, -bound, bound)

    w1 = u(ks[0], (n_in, hidden), n_in)
    b1 = u(ks[1], (1, hidden), n_in)
    w2 = u(ks[2], (hidden, hidden), hidden)
    b2 = u(ks[3], (1, hidden), hidden)
    w3 = u(ks[4], (hidden, 1), hidden)
    b3 = u(ks[5], (1, 1), hidden)
    return (w1, b1, w2, b2, w3, b3)


if __name__ == "__main__":
    # Small shapes implied by the module: nS = flattened obs dim, nA = action dim.
    B, nS, nA, hidden = 8, 12, 4, 32
    key = jax.random.PRNGKey(0)
    k_obs, k_act, k_par = jax.random.split(key, 3)

    obs = jax.random.normal(k_obs, (B, nS), jnp.float32)
    action = jax.random.normal(k_act, (B, nA), jnp.float32)
    params = init_params(k_par, nS + nA, hidden)

    out = usa_forward(obs, action, params)
    jax.block_until_ready(out)

    # Pure-JAX f32 reference (kernel streams activations/weights in bf16, so
    # compare with a tolerance covering bf16 rounding).
    w1, b1, w2, b2, w3, b3 = params
    x = jnp.concatenate([obs, action], axis=-1)
    h = jnp.maximum(x @ w1 + b1, 0.0)
    h = jnp.maximum(h @ w2 + b2, 0.0)
    ref = jax.nn.softplus(h @ w3 + b3)

    assert out.shape == (B, 1)
    assert jnp.allclose(out, ref, atol=5e-2, rtol=5e-2)

    print("KERNEL_OK")
</pallas_src>

<mosaic_0001>
module attributes {stable_mosaic.version = 11 : i64} {
  func.func @usa_kernel(%arg0: i32, %arg1: memref<16x12xbf16, #tpu.memory_space<vmem>>, %arg2: memref<16x4xbf16, #tpu.memory_space<vmem>>, %arg3: memref<12x32xbf16, #tpu.memory_space<vmem>>, %arg4: memref<4x32xbf16, #tpu.memory_space<vmem>>, %arg5: memref<1x32xf32, #tpu.memory_space<vmem>>, %arg6: memref<32x32xbf16, #tpu.memory_space<vmem>>, %arg7: memref<1x32xf32, #tpu.memory_space<vmem>>, %arg8: memref<1x32xf32, #tpu.memory_space<vmem>>, %arg9: memref<1x1xf32, #tpu.memory_space<smem>>, %arg10: memref<16x1xf32, #tpu.memory_space<vmem>>) attributes {dimension_semantics = [#tpu.dimension_semantics<parallel>], iteration_bounds = array<i64: 1>, scalar_prefetch = 0 : i64, scratch_operands = 0 : i64, tpu.core_type = #tpu.core_type<tc>, window_params = [{transform_indices = @transform_0, window_bounds = array<i64: 16, 12>}, {transform_indices = @transform_1, window_bounds = array<i64: 16, 4>}, {pipeline_mode = #tpu.pipeline_mode<synchronous>, transform_indices = @transform_2, window_bounds = array<i64: 12, 32>}, {pipeline_mode = #tpu.pipeline_mode<synchronous>, transform_indices = @transform_3, window_bounds = array<i64: 4, 32>}, {pipeline_mode = #tpu.pipeline_mode<synchronous>, transform_indices = @transform_4, window_bounds = array<i64: 1, 32>}, {pipeline_mode = #tpu.pipeline_mode<synchronous>, transform_indices = @transform_5, window_bounds = array<i64: 32, 32>}, {pipeline_mode = #tpu.pipeline_mode<synchronous>, transform_indices = @transform_6, window_bounds = array<i64: 1, 32>}, {pipeline_mode = #tpu.pipeline_mode<synchronous>, transform_indices = @transform_7, window_bounds = array<i64: 1, 32>}, {transform_indices = @transform_8, window_bounds = array<i64: 1, 1>}, {transform_indices = @transform_9, window_bounds = array<i64: 16, 1>}]} {
    %c0 = arith.constant 0 : index
    %c0_0 = arith.constant 0 : index
    %0 = vector.load %arg1[%c0, %c0_0] : memref<16x12xbf16, #tpu.memory_space<vmem>>, vector<16x12xbf16>
    %c0_1 = arith.constant 0 : index
    %c0_2 = arith.constant 0 : index
    %1 = vector.load %arg3[%c0_1, %c0_2] : memref<12x32xbf16, #tpu.memory_space<vmem>>, vector<12x32xbf16>
    %cst = arith.constant dense<0.000000e+00> : vector<16x32xf32>
    %2 = tpu.matmul %0, %1, %cst {dimension_numbers = #tpu.dot_dimension_numbers<[1], [0], [0], [1], [0, 0, 1, 1], [], []>} : vector<16x12xbf16>, vector<12x32xbf16>, vector<16x32xf32> -> vector<16x32xf32>
    %c0_3 = arith.constant 0 : index
    %c0_4 = arith.constant 0 : index
    %3 = vector.load %arg2[%c0_3, %c0_4] : memref<16x4xbf16, #tpu.memory_space<vmem>>, vector<16x4xbf16>
    %c0_5 = arith.constant 0 : index
    %c0_6 = arith.constant 0 : index
    %4 = vector.load %arg4[%c0_5, %c0_6] : memref<4x32xbf16, #tpu.memory_space<vmem>>, vector<4x32xbf16>
    %cst_7 = arith.constant dense<0.000000e+00> : vector<16x32xf32>
    %5 = tpu.matmul %3, %4, %cst_7 {dimension_numbers = #tpu.dot_dimension_numbers<[1], [0], [0], [1], [0, 0, 1, 1], [], []>} : vector<16x4xbf16>, vector<4x32xbf16>, vector<16x32xf32> -> vector<16x32xf32>
    %6 = arith.addf %2, %5 : vector<16x32xf32>
    %c0_8 = arith.constant 0 : index
    %c0_9 = arith.constant 0 : index
    %7 = vector.load %arg5[%c0_8, %c0_9] : memref<1x32xf32, #tpu.memory_space<vmem>>, vector<1x32xf32>
    %8 = vector.broadcast %7 : vector<1x32xf32> to vector<16x32xf32>
    %9 = arith.addf %6, %8 : vector<16x32xf32>
    %cst_10 = arith.constant 0.000000e+00 : f32
    %10 = vector.broadcast %cst_10 : f32 to vector<16x32xf32>
    %11 = arith.maximumf %9, %10 : vector<16x32xf32>
    %12 = arith.truncf %11 : vector<16x32xf32> to vector<16x32xbf16>
    %c0_11 = arith.constant 0 : index
    %c0_12 = arith.constant 0 : index
    %13 = vector.load %arg6[%c0_11, %c0_12] : memref<32x32xbf16, #tpu.memory_space<vmem>>, vector<32x32xbf16>
    %cst_13 = arith.constant dense<0.000000e+00> : vector<16x32xf32>
    %14 = tpu.matmul %12, %13, %cst_13 {dimension_numbers = #tpu.dot_dimension_numbers<[1], [0], [0], [1], [0, 0, 1, 1], [], []>} : vector<16x32xbf16>, vector<32x32xbf16>, vector<16x32xf32> -> vector<16x32xf32>
    %c0_14 = arith.constant 0 : index
    %c0_15 = arith.constant 0 : index
    %15 = vector.load %arg7[%c0_14, %c0_15] : memref<1x32xf32, #tpu.memory_space<vmem>>, vector<1x32xf32>
    %16 = vector.broadcast %15 : vector<1x32xf32> to vector<16x32xf32>
    %17 = arith.addf %14, %16 : vector<16x32xf32>
    %cst_16 = arith.constant 0.000000e+00 : f32
    %18 = vector.broadcast %cst_16 : f32 to vector<16x32xf32>
    %19 = arith.maximumf %17, %18 : vector<16x32xf32>
    %c0_17 = arith.constant 0 : index
    %c0_18 = arith.constant 0 : index
    %20 = vector.load %arg8[%c0_17, %c0_18] : memref<1x32xf32, #tpu.memory_space<vmem>>, vector<1x32xf32>
    %21 = vector.broadcast %20 : vector<1x32xf32> to vector<16x32xf32>
    %22 = arith.mulf %19, %21 : vector<16x32xf32>
    %cst_19 = arith.constant dense<0.000000e+00> : vector<16xf32>
    %23 = vector.multi_reduction <add>, %22, %cst_19 [1] : vector<16x32xf32> to vector<16xf32>
    %24 = vector.shape_cast %23 : vector<16xf32> to vector<16x1xf32>
    %c0_20 = arith.constant 0 : index
    %c0_21 = arith.constant 0 : index
    %25 = memref.load %arg9[%c0_20, %c0_21] : memref<1x1xf32, #tpu.memory_space<smem>>
    %26 = vector.broadcast %25 : f32 to vector<16x1xf32>
    %27 = arith.addf %24, %26 : vector<16x1xf32>
    %cst_22 = arith.constant 0.000000e+00 : f32
    %28 = vector.broadcast %cst_22 : f32 to vector<16x1xf32>
    %29 = arith.maximumf %27, %28 : vector<16x1xf32>
    %30 = math.absf %27 : vector<16x1xf32>
    %cst_23 = arith.constant 0.000000e+00 : f32
    %31 = vector.broadcast %cst_23 : f32 to vector<16x1xf32>
    %32 = arith.subf %31, %30 : vector<16x1xf32>
    %33 = math.exp %32 : vector<16x1xf32>
    %34 = math.log1p %33 : vector<16x1xf32>
    %35 = arith.addf %29, %34 : vector<16x1xf32>
    %c0_24 = arith.constant 0 : index
    %c0_25 = arith.constant 0 : index
    %36 = vector.load %arg10[%c0_24, %c0_25] : memref<16x1xf32, #tpu.memory_space<vmem>>, vector<16x1xf32>
    tpu.vector_store %arg10[%c0_24, %c0_25], %35 {strides = array<i32>} : memref<16x1xf32, #tpu.memory_space<vmem>>, vector<16x1xf32>,
    return
  }
  func.func @transform_0(%arg0: i32) -> (i32, i32) {
    %c0_i32 = arith.constant 0 : i32
    %c0_i32_0 = arith.constant 0 : i32
    return %arg0, %c0_i32 : i32, i32
  }
  func.func @transform_1(%arg0: i32) -> (i32, i32) {
    %c0_i32 = arith.constant 0 : i32
    %c0_i32_0 = arith.constant 0 : i32
    return %arg0, %c0_i32 : i32, i32
  }
  func.func @transform_2(%arg0: i32) -> (i32, i32) {
    %c0_i32 = arith.constant 0 : i32
    %c0_i32_0 = arith.constant 0 : i32
    %c0_i32_1 = arith.constant 0 : i32
    return %c0_i32, %c0_i32_0 : i32, i32
  }
  func.func @transform_3(%arg0: i32) -> (i32, i32) {
    %c0_i32 = arith.constant 0 : i32
    %c0_i32_0 = arith.constant 0 : i32
    %c0_i32_1 = arith.constant 0 : i32
    return %c0_i32, %c0_i32_0 : i32, i32
  }
  func.func @transform_4(%arg0: i32) -> (i32, i32) {
    %c0_i32 = arith.constant 0 : i32
    %c0_i32_0 = arith.constant 0 : i32
    %c0_i32_1 = arith.constant 0 : i32
    return %c0_i32, %c0_i32_0 : i32, i32
  }
  func.func @transform_5(%arg0: i32) -> (i32, i32) {
    %c0_i32 = arith.constant 0 : i32
    %c0_i32_0 = arith.constant 0 : i32
    %c0_i32_1 = arith.constant 0 : i32
    return %c0_i32, %c0_i32_0 : i32, i32
  }
  func.func @transform_6(%arg0: i32) -> (i32, i32) {
    %c0_i32 = arith.constant 0 : i32
    %c0_i32_0 = arith.constant 0 : i32
    %c0_i32_1 = arith.constant 0 : i32
    return %c0_i32, %c0_i32_0 : i32, i32
  }
  func.func @transform_7(%arg0: i32) -> (i32, i32) {
    %c0_i32 = arith.constant 0 : i32
    %c0_i32_0 = arith.constant 0 : i32
    %c0_i32_1 = arith.constant 0 : i32
    return %c0_i32, %c0_i32_0 : i32, i32
  }
  func.func @transform_8(%arg0: i32) -> (i32, i32) {
    %c0_i32 = arith.constant 0 : i32
    %c0_i32_0 = arith.constant 0 : i32
    %c0_i32_1 = arith.constant 0 : i32
    return %c0_i32, %c0_i32_0 : i32, i32
  }
  func.func @transform_9(%arg0: i32) -> (i32, i32) {
    %c0_i32 = arith.constant 0 : i32
    %c0_i32_0 = arith.constant 0 : i32
    return %arg0, %c0_i32 : i32, i32
  }
}

</mosaic_0001>

<bundles_post_ra>
// kernel: tpu_custom_call.1
= control target key start
LH: loop header
LB: loop body
LE: loop exit
PB: predicated region body
PF: predicated region fallthrough
CT: control target
= control target key end

     0   :  { %15 = vsyncpa [#allocation4], 0  ;;  %s535_s0 = inlined_call_operand.vmem [shape: bf16[16,12], index: 0, kind: input, shape index: {}]   ;;  %s536_s1 = inlined_call_operand.vmem [shape: bf16[16,4], index: 1, kind: input, shape index: {}]   ;;  %s537_s2 = inlined_call_operand.vmem [shape: bf16[12,32], index: 2, kind: input, shape index: {}]   ;;  %s538_s3 = inlined_call_operand.hbm [shape: bf16[4,32], index: 3, kind: input, shape index: {}]   ;;  %s539_s4 = inlined_call_operand.hbm [shape: f32[1,32], index: 4, kind: input, shape index: {}]   ;;  %s540_s5 = inlined_call_operand.vmem [shape: bf16[32,32], index: 5, kind: input, shape index: {}]   ;;  %s541_s6 = inlined_call_operand.vmem [shape: f32[1,32], index: 6, kind: input, shape index: {}]   ;;  %s542_s7 = inlined_call_operand.vmem [shape: f32[1,32], index: 7, kind: input, shape index: {}]   ;;  %s543_s8 = inlined_call_operand.<no memory space> [shape: f32[1,1], index: 8, kind: input, shape index: {}]   ;;  %s544_s9 = inlined_call_operand.vmem [shape: f32[16,1], index: 9, kind: output, shape index: {}]  }
   0x1   :  { %16 = vsyncpa [#allocation6], 0  ;;  %s421_s30 = smov [#allocation3]   ;;  %s422_s11 = smov [#allocation5]  }
   0x2   :  { %s29_s10 = sshll.u32 %s421_s30, 4  ;;  %s39_s12 = sshll.u32 %s422_s11, 4  ;;  %s30_s10 = int_to_ptr.vmem [resolvable:$true] %s29_s10  ;;  %s40_s12 = int_to_ptr.vmem [resolvable:$true] %s39_s12 }
   0x3   :  { %s373_s15 = scalar_lea.hbm %s538_s3, 32 }
   0x4   :  { %p374_p0 = scmp.ne.s32.totalorder %s538_s3, %s373_s15  ;;  %p377_p1 = scmp.lt.u32.totalorder %s373_s15, %s538_s3 }
   0x6   :  { %p379_p2 = pnand %p377_p1, %p374_p0 }
   0x8   :  { %382 = shalt.err (!%p379_p2)
}
   0x9   :  { %s383_s20 = scalar_lea.vmem %s30_s10, 32  ;;  %p388_p4 = scmp.lt.s32.totalorder %s30_s10, %s30_s10 }
   0xa   :  { %p384_p3 = scmp.ne.s32.totalorder %s30_s10, %s383_s20  ;;  %p389_p5 = scmp.lt.s32.totalorder %s383_s20, %s383_s20 }
   0xc   :  { %p390_p6 = por %p389_p5, %p388_p4 }
   0xe   :  { %p391_p7 = pnand %p390_p6, %p384_p3 }
  0x10   :  { %394 = shalt.err (!%p391_p7)
}
  0x11   :  { %32 = dma.hbm_to_vmem [thread:$0]  %s538_s3, 32, %s30_s10, [#allocation4]  }
  0x12   :  { %s395_s25 = scalar_lea.hbm %s539_s4, 16 }
  0x13   :  { %p396_p8 = scmp.ne.s32.totalorder %s539_s4, %s395_s25  ;;  %p399_p9 = scmp.lt.u32.totalorder %s395_s25, %s539_s4 }
  0x15   :  { %p401_p10 = pnand %p399_p9, %p396_p8 }
  0x17   :  { %404 = shalt.err (!%p401_p10)
}
  0x18   :  { %s405_s30 = scalar_lea.vmem %s40_s12, 16  ;;  %s409_s11 = scalar_lea.vmem %s40_s12, 32 }
  0x19   :  { %p406_p11 = scmp.ne.s32.totalorder %s40_s12, %s405_s30  ;;  %p410_p12 = scmp.lt.s32.totalorder %s40_s12, %s40_s12 }
  0x1a   :  { %p411_p13 = scmp.lt.s32.totalorder %s409_s11, %s405_s30 }
  0x1c   :  { %p412_p0 = por %p411_p13, %p410_p12 }
  0x1e   :  { %p413_p1 = pnand %p412_p0, %p406_p11 }
  0x20   :  { %416 = shalt.err (!%p413_p1)
}
  0x21   :  { %42 = dma.hbm_to_vmem [thread:$0]  %s539_s4, 16, %s40_s12, [#allocation6]  }
  0x22   :  { %417 = dma.done.wait [#allocation4], 32  }
  0x23   :  { %418 = vsyncadd [#allocation4], 4294967264 }
  0x24   :  { %419 = dma.done.wait [#allocation6], 16  }
  0x25   :  { %420 = vsyncadd [#allocation6], 4294967280  ;;  %v423_v0 = vmov 0.0   ;;  %vm424_vm0 = vmmov 0   ;;  %vm74_vm1 = vcmask 1041408   ;;  %vm133_vm2 = vcmask 1045504  }
  0x26   :  { %336 = vmatprep.subr.bf16.mxu0 %v423_v0  ;;  %342 = vmatprep.subr.bf16.mxu1 %v423_v0  ;;  %vm70_vm3 = vcmask 31744   ;;  %v64_v1 = vld [vmem:[#allocation3] sm:$0x3]  ;;  %vm129_vm4 = vcmask 97280   ;;  %v364_v8 = vld [vmem:[%s540_s5 + $0x8] sm:$0xff]   ;;  %vm213_vm5 = vcmask 261120   ;;  %v276_v39 = vstv %s543_s8 }
  0x27   :  { %338 = vmatprep.mubr.msk.bf16.mxu0 %vm424_vm0, %v423_v0  ;;  %344 = vmatprep.mubr.msk.bf16.mxu1 %vm424_vm0, %v423_v0  ;;  %v76_v2 = vsel %vm74_vm1, %v64_v1, 0  ;;  %v360_v3 = vld [vmem:[%s537_s2] sm:$0x3f]   ;;  %vm309_vm7 = vcmask 7168  }
  0x28   :  { %v361_v4 = vld [vmem:[%s536_s1] sm:$0xff]   ;;  %337 = vmatpush3.bf16.msra.mxu0 %v76_v2  ;;  %v135_v5 = vsel %vm133_vm2, %v360_v3, 0 }
  0x29   :  { %v362_v6 = vld [vmem:[%s535_s0] sm:$0xff]   ;;  %348 = vmatprep.subr.bf16.mxu0 %v423_v0  ;;  %343 = vmatpush3.bf16.msra.mxu1 %v135_v5 }
  0x2a   :  { %v363_v7 = vld [vmem:[%s540_s5] sm:$0xff]  }
  0x2b   :  { %339 = vmatmul.mubr.msk.bf16.vlgmr.msra.gmra.mrb[0].mxu0 %vm70_vm3, %v361_v4  ;;  %v323_v13 = vld [vmem:[#allocation5] ss:$0 sm:$0xff]  ;;  %v324_v25 = vld [vmem:[%s541_s6] ss:$0 sm:$0xff] }
  0x2c   :  { %352 = vmatprep.mubr.msk.bf16.mxu0 %vm424_vm0, %v423_v0  ;;  %345 = vmatmul.mubr.msk.bf16.vlgmr.msra.gmra.mrb[0].mxu1 %vm129_vm4, %v362_v6  ;;  %v328_v30 = vld [vmem:[%s542_s7] ss:$0 sm:$0xff] }
  0x2d   :  { %349 = vmatpush3.bf16.msra.mxu0 %v363_v7 }
  0x2e   :  { %350 = vmatprep.subr.bf16.mxu0 %v423_v0 }
  0x31   :  { %351 = vmatpush3.bf16.msra.mxu0 %v364_v8 }
  0xfe   :  { %v112_v9 = vpop.f32.mrb[0].mxu0 }
  0xff   :  { %v340_v10 = vpop.f32.mrb[1].mxu0  ;;  %v171_v12 = vpop.f32.mrb[0].mxu1 }
 0x100   :  { %v115_v11 = vpop.f32.mrb[2].mxu0  ;;  %v172_v14 = vadd.f32 %v171_v12, %v112_v9  ;;  %v346_v16 = vpop.f32.mrb[1].mxu1 }
 0x101   :  { %v341_v15 = vpop.f32.mrb[3].mxu0  ;;  %v174_v17 = vpop.f32.mrb[2].mxu1 }
 0x102   :  { %v185_v18 = vadd.f32 %v323_v13, %v172_v14  ;;  %v175_v19 = vadd.f32 %v174_v17, %v115_v11  ;;  %v347_v20 = vpop.f32.mrb[3].mxu1 }
 0x104   :  { %v186_v21 = vadd.f32 %v323_v13, %v175_v19  ;;  %v187_v22 = vmax.f32 %v185_v18, 0.0 }
 0x106   :  { %v188_v23 = vmax.f32 %v186_v21, 0.0 }
 0x108   :  { %v189_v24 = vpack.c.bf16 %v188_v23, %v187_v22 }
 0x10a   :  { %353 = vmatmul.mubr.msk.bf16.vlgmr.msra.gmra.mrb[4].mxu0 %vm213_vm5, %v189_v24 }
 0x1dd   :  { %v251_v26 = vpop.f32.mrb[4].mxu0 }
 0x1de   :  { %v252_v27 = vadd.f32 %v324_v25, %v251_v26  ;;  %v354_v28 = vpop.f32.mrb[5].mxu0 }
 0x1df   :  { %v254_v29 = vpop.f32.mrb[6].mxu0 }
 0x1e0   :  { %v258_v31 = vmax.f32 %v252_v27, 0.0  ;;  %v255_v32 = vadd.f32 %v324_v25, %v254_v29  ;;  %v355_v33 = vpop.f32.mrb[7].mxu0 }
 0x1e2   :  { %v259_v34 = vmax.f32 %v255_v32, 0.0  ;;  %v267_v35 = vmul.f32 %v328_v30, %v258_v31 }
 0x1e4   :  { %v269_v36 = vsel %vm213_vm5, %v267_v35, 0.0  ;;  %v268_v37 = vmul.f32 %v328_v30, %v259_v34 }
 0x1e5   :  { %270 = vadd.xlane.f32.xlu0 %v269_v36 }
 0x1e6   :  { %v272_v38 = vsel %vm213_vm5, %v268_v37, 0.0 }
 0x1e9   :  { %273 = vadd.xlane.f32.xlu0 %v272_v38 }
 0x272   :  { %v271_v40 = vpop.xlane.xlu0 %270 }
 0x273   :  { %v277_v41 = vadd.f32 %v276_v39, %v271_v40 }
 0x275   :  { %v281_v42 = vand.u32 2147483647, %v277_v41  ;;  %v279_v62 = vmax.f32 %v277_v41, 0.0 }
 0x276   :  { %v274_v43 = vpop.xlane.xlu0 %273 }
 0x277   :  { %v283_v44 = vsub.f32 0.0, %v281_v42  ;;  %v278_v45 = vadd.f32 %v276_v39, %v274_v43 }
 0x279   :  { %v285_v46 = vmul.f32 1.442695, %v283_v44  ;;  %v282_v47 = vand.u32 2147483647, %v278_v45  ;;  %v280_v5 = vmax.f32 %v278_v45, 0.0 }
 0x27b   :  { %365 = vpow2.f32 %v285_v46  ;;  %v284_v48 = vsub.f32 0.0, %v282_v47 }
 0x27d   :  { %v287_v49 = vmul.f32 1.442695, %v284_v48 }
 0x27f   :  { %367 = vpow2.f32 %v287_v49 }
 0x285   :  { %v366_v50 = vpop.eup %365 }
 0x286   :  { %v289_v51 = vadd.f32 1.0, %v366_v50  ;;  %v292_v54 = vmul.f32 -0.5, %v366_v50  ;;  %v295_v57 = vand.u32 2147483647, %v366_v50 }
 0x288   :  { %369 = vlog2.f32 %v289_v51  ;;  %v293_v55 = vadd.f32 1.0, %v292_v54  ;;  %vm296_vm6 = vcmp.lt.f32.partialorder %v295_v57, 0.0004427343 }
 0x289   :  { %v368_v52 = vpop.eup %367 }
 0x28a   :  { %v298_v53 = vadd.f32 1.0, %v368_v52  ;;  %v301_v56 = vmul.f32 -0.5, %v368_v52  ;;  %v294_v60 = vmul.f32 %v366_v50, %v293_v55  ;;  %v304_v63 = vand.u32 2147483647, %v368_v52 }
 0x28c   :  { %371 = vlog2.f32 %v298_v53  ;;  %v302_v61 = vadd.f32 1.0, %v301_v56  ;;  %vm305_vm8 = vcmp.lt.f32.partialorder %v304_v63, 0.0004427343 }
 0x28e   :  { %v303_v4 = vmul.f32 %v368_v52, %v302_v61 }
 0x292   :  { %v370_v58 = vpop.eup %369 }
 0x293   :  { %v291_v59 = vmul.f32 0.6931472, %v370_v58 }
 0x295   :  { %v297_v0 = vsel %vm296_vm6, %v294_v60, %v291_v59 }
 0x296   :  { %v372_v1 = vpop.eup %371  ;;  %v307_v2 = vadd.f32 %v297_v0, %v279_v62 }
 0x297   :  { %v300_v3 = vmul.f32 0.6931472, %v372_v1 }
 0x298   :  { %310 = vst.msk [vmem:[%s544_s9] sm:$0xff] %vm309_vm7, %v307_v2 }
 0x299   :  { %v306_v6 = vsel %vm305_vm8, %v303_v4, %v300_v3 }
 0x29a   :  { %v308_v7 = vadd.f32 %v306_v6, %v280_v5 }
 0x29c   :  { %311 = vst.msk [vmem:[%s544_s9 + $0x8] sm:$0xff] %vm309_vm7, %v308_v7 }
 0x29d   :  { %316 = vsyncpa [#allocation4], 1 }
 0x29e   :  { %317 = vsyncpa [#allocation6], 1 }

</bundles_post_ra>
